<compile_context>
chip_gen: v7x
topology: tpu7x:2x2x1
jax: 0.10.0
libtpu: 0.0.40
codegen_flags: <defaults>
</compile_context>

<pallas_src>
import functools

import jax
import jax.numpy as jnp
from jax.experimental import pallas as pl
from jax.experimental.pallas import tpu as pltpu


def lstm_stacked_kernel(states_ref, params_ref, ret_ref, *,
                        unroll_for, num_cell, hidden):
    """Whole model in one grid-less kernel (tiny shapes, fully VMEM-resident).

    states_ref: (1 + 2*num_cell, B, H)  packed [x, h0_0..h0_{n-1}, c0_0..c0_{n-1}]
    params_ref: (num_cell, 2H+1, 4H)    packed [[W_ih^T ; W_hh^T] ; b_ih+b_hh],
                                        gate columns reordered to [i, f, o, g]
    ret_ref:    (B, T*H)                lane-dense stacked per-step outputs
    """
    H = hidden

    # Hoist loop-invariant loads: one load per layer, not per (t, layer).
    ws, bs = [], []
    for i in range(num_cell):
        p = params_ref[i]                       # (2H+1, 4H)
        ws.append(p[:2 * H, :])                 # (2H, 4H)
        bs.append(p[2 * H:2 * H + 1, :])        # (1, 4H)
    hs = [states_ref[1 + i] for i in range(num_cell)]              # (B, H)
    cs = [states_ref[1 + num_cell + i] for i in range(num_cell)]   # (B, H)
    out = states_ref[0]                                            # (B, H)

    outs = []
    for _t in range(unroll_for):                # static unroll, small trip count
        for i in range(num_cell):
            # Fused input/hidden projection: [out, h] @ [W_ih^T ; W_hh^T] + b.
            z = jnp.concatenate([out, hs[i]], axis=-1)              # (B, 2H)
            gates = (jnp.dot(z, ws[i], preferred_element_type=jnp.float32)
                     + bs[i])                                       # (B, 4H) [i,f,o,g]
            # One sigmoid pass over i/f/o, one tanh for g: 2 EUP launches.
            sg = jax.nn.sigmoid(gates[:, :3 * H])
            g_g = jnp.tanh(gates[:, 3 * H:])
            i_g = sg[:, 0 * H:1 * H]
            f_g = sg[:, 1 * H:2 * H]
            o_g = sg[:, 2 * H:3 * H]
            c_new = f_g * cs[i] + i_g * g_g
            h_new = o_g * jnp.tanh(c_new)       # 3rd and last EUP launch
            cs[i] = c_new
            hs[i] = h_new
            out = h_new
        outs.append(out)

    # One lane-dense slab store (fine at T=4; switch to per-step stores if T grows).
    ret_ref[...] = jnp.concatenate(outs, axis=-1).astype(ret_ref.dtype)


def prepare_lstm_params(w_ih, w_hh, b_ih, b_hh):
    """Fuse + reorder LSTM weights once, outside the per-call path.

    w_ih/w_hh: (num_cell, 4H, H), gate rows in PyTorch order [i, f, g, o].
    b_ih/b_hh: (num_cell, 4H).
    Returns (num_cell, 2H+1, 4H): rows 0..2H-1 = [W_ih^T ; W_hh^T], row 2H =
    b_ih+b_hh, with gate columns permuted to [i, f, o, g].
    """
    num_cell, four_h, H = w_ih.shape
    assert four_h == 4 * H
    w_cat = jnp.concatenate([jnp.transpose(w_ih, (0, 2, 1)),
                             jnp.transpose(w_hh, (0, 2, 1))], axis=1)   # (nc, 2H, 4H)
    b_sum = (b_ih + b_hh)[:, None, :]                                   # (nc, 1, 4H)

    def reorder_ifgo_to_ifog(a):
        return jnp.concatenate([a[..., :2 * H],          # i, f
                                a[..., 3 * H:4 * H],      # o
                                a[..., 2 * H:3 * H]],     # g
                               axis=-1)

    w_cat = reorder_ifgo_to_ifog(w_cat)
    b_sum = reorder_ifgo_to_ifog(b_sum)
    return jnp.concatenate([w_cat, b_sum], axis=1)        # (nc, 2H+1, 4H)


def lstm_cell_stacked(inputs, labels, params, *, unroll_for):
    """inputs: tuple (x, h0_0, c0_0, h0_1, c0_1, ...), each (B, H);
    labels: tuple with labels[0] of shape (B, T, H);
    params: pre-fused weights from prepare_lstm_params().
    Returns (ret (B, T, H), loss scalar) like the torch module."""
    num_cell = params.shape[0]
    H = params.shape[2] // 4
    x = inputs[0]                                      # (B, H)
    B = x.shape[0]
    T = unroll_for

    # Single packed state buffer: [x, h0_0..h0_{n-1}, c0_0..c0_{n-1}].
    h0 = [inputs[1 + 2 * i] for i in range(num_cell)]
    c0 = [inputs[2 + 2 * i] for i in range(num_cell)]
    states = jnp.stack([x] + h0 + c0, axis=0)          # (1+2*nc, B, H)

    kernel = functools.partial(lstm_stacked_kernel,
                               unroll_for=T, num_cell=num_cell, hidden=H)

    vmem = pl.BlockSpec(memory_space=pltpu.MemorySpace.VMEM)
    ret_flat = pl.pallas_call(
        kernel,
        out_shape=jax.ShapeDtypeStruct((B, T * H), jnp.float32),
        in_specs=[vmem, vmem],
        out_specs=vmem,
    )(states, params)

    ret = ret_flat.reshape(B, T, H)                    # == torch.stack(ret, dim=1)
    # MSE in the wrapper (plain jnp; XLA fuses) -- keeps the kernel tail short.
    loss = jnp.mean((ret - labels[0]) ** 2)
    return ret, loss


def _reference(inputs, labels, w_ih, w_hh, b_ih, b_hh, *, unroll_for):
    """Pure-JAX mirror of the torch module, for correctness checking."""
    out = inputs[0]
    num_cell = w_ih.shape[0]
    H = out.shape[-1]
    hs = [inputs[1 + 2 * i] for i in range(num_cell)]
    cs = [inputs[2 + 2 * i] for i in range(num_cell)]
    rets = []
    for _ in range(unroll_for):
        for i in range(num_cell):
            gates = out @ w_ih[i].T + b_ih[i] + hs[i] @ w_hh[i].T + b_hh[i]
            ig = jax.nn.sigmoid(gates[:, 0 * H:1 * H])
            fg = jax.nn.sigmoid(gates[:, 1 * H:2 * H])
            gg = jnp.tanh(gates[:, 2 * H:3 * H])
            og = jax.nn.sigmoid(gates[:, 3 * H:4 * H])
            cs[i] = fg * cs[i] + ig * gg
            hs[i] = og * jnp.tanh(cs[i])
            out = hs[i]
        rets.append(out)
    ret = jnp.stack(rets, axis=1)
    loss = jnp.mean((ret - labels[0]) ** 2)
    return ret, loss


if __name__ == "__main__":
    B = 2
    H = 2            # module hardwires input_size == hidden_size == 2
    UNROLL = 4       # unroll_for
    NUM_CELL = 2     # num_lstmcell

    key = jax.random.PRNGKey(0)
    keys = jax.random.split(key, 7)

    # torch.nn.LSTMCell default init: U(-1/sqrt(hidden), 1/sqrt(hidden))
    bound = 1.0 / (H ** 0.5)
    w_ih = jax.random.uniform(keys[0], (NUM_CELL, 4 * H, H), jnp.float32, -bound, bound)
    w_hh = jax.random.uniform(keys[1], (NUM_CELL, 4 * H, H), jnp.float32, -bound, bound)
    b_ih = jax.random.uniform(keys[2], (NUM_CELL, 4 * H), jnp.float32, -bound, bound)
    b_hh = jax.random.uniform(keys[3], (NUM_CELL, 4 * H), jnp.float32, -bound, bound)

    x = jax.random.normal(keys[4], (B, H), jnp.float32)
    states = jax.random.normal(keys[5], (2 * NUM_CELL, B, H), jnp.float32)
    inputs = (x,) + tuple(states[i] for i in range(2 * NUM_CELL))   # (x, h0,c0, h1,c1)
    labels = (jax.random.normal(keys[6], (B, UNROLL, H), jnp.float32),)

    # Fuse weights once, outside the jitted per-call path.
    params = jax.block_until_ready(prepare_lstm_params(w_ih, w_hh, b_ih, b_hh))

    fn = jax.jit(functools.partial(lstm_cell_stacked, unroll_for=UNROLL))
    ret, loss = fn(inputs, labels, params)
    jax.block_until_ready((ret, loss))

    assert ret.shape == (B, UNROLL, H)
    assert loss.shape == ()

    ret_ref, loss_ref = _reference(inputs, labels, w_ih, w_hh, b_ih, b_hh,
                                   unroll_for=UNROLL)
    assert jnp.allclose(ret, ret_ref, atol=1e-4, rtol=1e-4)
    assert jnp.allclose(loss, loss_ref, atol=1e-4, rtol=1e-4)
    print("KERNEL_OK")
</pallas_src>

<mosaic_0001>
module attributes {stable_mosaic.version = 11 : i64} {
  func.func @lstm_stacked_kernel(%arg0: memref<5x2x2xf32, #tpu.memory_space<vmem>>, %arg1: memref<2x5x8xf32, #tpu.memory_space<vmem>>, %arg2: memref<2x8xf32, #tpu.memory_space<vmem>>) attributes {dimension_semantics = [], scalar_prefetch = 0 : i64, scratch_operands = 0 : i64, tpu.core_type = #tpu.core_type<tc>} {
    %c0 = arith.constant 0 : index
    %c0_0 = arith.constant 0 : index
    %c0_1 = arith.constant 0 : index
    %0 = vector.load %arg1[%c0, %c0_0, %c0_1] : memref<2x5x8xf32, #tpu.memory_space<vmem>>, vector<1x5x8xf32>
    %1 = vector.shape_cast %0 : vector<1x5x8xf32> to vector<5x8xf32>
    %2 = vector.extract_strided_slice %1 {offsets = [0, 0], sizes = [4, 8], strides = [1, 1]} : vector<5x8xf32> to vector<4x8xf32>
    %3 = vector.extract_strided_slice %1 {offsets = [4, 0], sizes = [1, 8], strides = [1, 1]} : vector<5x8xf32> to vector<1x8xf32>
    %c1 = arith.constant 1 : index
    %c0_2 = arith.constant 0 : index
    %c0_3 = arith.constant 0 : index
    %4 = vector.load %arg1[%c1, %c0_2, %c0_3] : memref<2x5x8xf32, #tpu.memory_space<vmem>>, vector<1x5x8xf32>
    %5 = vector.shape_cast %4 : vector<1x5x8xf32> to vector<5x8xf32>
    %6 = vector.extract_strided_slice %5 {offsets = [0, 0], sizes = [4, 8], strides = [1, 1]} : vector<5x8xf32> to vector<4x8xf32>
    %7 = vector.extract_strided_slice %5 {offsets = [4, 0], sizes = [1, 8], strides = [1, 1]} : vector<5x8xf32> to vector<1x8xf32>
    %c1_4 = arith.constant 1 : index
    %c0_5 = arith.constant 0 : index
    %c0_6 = arith.constant 0 : index
    %8 = vector.load %arg0[%c1_4, %c0_5, %c0_6] : memref<5x2x2xf32, #tpu.memory_space<vmem>>, vector<1x2x2xf32>
    %9 = vector.shape_cast %8 : vector<1x2x2xf32> to vector<2x2xf32>
    %c2 = arith.constant 2 : index
    %c0_7 = arith.constant 0 : index
    %c0_8 = arith.constant 0 : index
    %10 = vector.load %arg0[%c2, %c0_7, %c0_8] : memref<5x2x2xf32, #tpu.memory_space<vmem>>, vector<1x2x2xf32>
    %11 = vector.shape_cast %10 : vector<1x2x2xf32> to vector<2x2xf32>
    %c3 = arith.constant 3 : index
    %c0_9 = arith.constant 0 : index
    %c0_10 = arith.constant 0 : index
    %12 = vector.load %arg0[%c3, %c0_9, %c0_10] : memref<5x2x2xf32, #tpu.memory_space<vmem>>, vector<1x2x2xf32>
    %13 = vector.shape_cast %12 : vector<1x2x2xf32> to vector<2x2xf32>
    %c4 = arith.constant 4 : index
    %c0_11 = arith.constant 0 : index
    %c0_12 = arith.constant 0 : index
    %14 = vector.load %arg0[%c4, %c0_11, %c0_12] : memref<5x2x2xf32, #tpu.memory_space<vmem>>, vector<1x2x2xf32>
    %15 = vector.shape_cast %14 : vector<1x2x2xf32> to vector<2x2xf32>
    %c0_13 = arith.constant 0 : index
    %c0_14 = arith.constant 0 : index
    %c0_15 = arith.constant 0 : index
    %16 = vector.load %arg0[%c0_13, %c0_14, %c0_15] : memref<5x2x2xf32, #tpu.memory_space<vmem>>, vector<1x2x2xf32>
    %17 = vector.shape_cast %16 : vector<1x2x2xf32> to vector<2x2xf32>
    %18 = tpu.concatenate %17, %9 in 1 : vector<2x2xf32>, vector<2x2xf32> -> vector<2x4xf32>
    %cst = arith.constant dense<0.000000e+00> : vector<2x8xf32>
    %19 = tpu.matmul %18, %2, %cst {dimension_numbers = #tpu.dot_dimension_numbers<[1], [0], [0], [1], [0, 0, 1, 1], [], []>} : vector<2x4xf32>, vector<4x8xf32>, vector<2x8xf32> -> vector<2x8xf32>
    %20 = vector.broadcast %3 : vector<1x8xf32> to vector<2x8xf32>
    %21 = arith.addf %19, %20 : vector<2x8xf32>
    %22 = vector.extract_strided_slice %21 {offsets = [0, 0], sizes = [2, 6], strides = [1, 1]} : vector<2x8xf32> to vector<2x6xf32>
    %23 = arith.negf %22 : vector<2x6xf32>
    %24 = math.exp %23 : vector<2x6xf32>
    %cst_16 = arith.constant 1.000000e+00 : f32
    %25 = vector.broadcast %cst_16 : f32 to vector<2x6xf32>
    %26 = arith.addf %25, %24 : vector<2x6xf32>
    %27 = arith.divf %25, %26 : vector<2x6xf32>
    %28 = vector.extract_strided_slice %21 {offsets = [0, 6], sizes = [2, 2], strides = [1, 1]} : vector<2x8xf32> to vector<2x2xf32>
    %29 = math.tanh %28 : vector<2x2xf32>
    %30 = vector.extract_strided_slice %27 {offsets = [0, 0], sizes = [2, 2], strides = [1, 1]} : vector<2x6xf32> to vector<2x2xf32>
    %31 = vector.extract_strided_slice %27 {offsets = [0, 2], sizes = [2, 2], strides = [1, 1]} : vector<2x6xf32> to vector<2x2xf32>
    %32 = vector.extract_strided_slice %27 {offsets = [0, 4], sizes = [2, 2], strides = [1, 1]} : vector<2x6xf32> to vector<2x2xf32>
    %33 = arith.mulf %31, %13 : vector<2x2xf32>
    %34 = arith.mulf %30, %29 : vector<2x2xf32>
    %35 = arith.addf %33, %34 : vector<2x2xf32>
    %36 = math.tanh %35 : vector<2x2xf32>
    %37 = arith.mulf %32, %36 : vector<2x2xf32>
    %38 = tpu.concatenate %37, %11 in 1 : vector<2x2xf32>, vector<2x2xf32> -> vector<2x4xf32>
    %cst_17 = arith.constant dense<0.000000e+00> : vector<2x8xf32>
    %39 = tpu.matmul %38, %6, %cst_17 {dimension_numbers = #tpu.dot_dimension_numbers<[1], [0], [0], [1], [0, 0, 1, 1], [], []>} : vector<2x4xf32>, vector<4x8xf32>, vector<2x8xf32> -> vector<2x8xf32>
    %40 = vector.broadcast %7 : vector<1x8xf32> to vector<2x8xf32>
    %41 = arith.addf %39, %40 : vector<2x8xf32>
    %42 = vector.extract_strided_slice %41 {offsets = [0, 0], sizes = [2, 6], strides = [1, 1]} : vector<2x8xf32> to vector<2x6xf32>
    %43 = arith.negf %42 : vector<2x6xf32>
    %44 = math.exp %43 : vector<2x6xf32>
    %cst_18 = arith.constant 1.000000e+00 : f32
    %45 = vector.broadcast %cst_18 : f32 to vector<2x6xf32>
    %46 = arith.addf %45, %44 : vector<2x6xf32>
    %47 = arith.divf %45, %46 : vector<2x6xf32>
    %48 = vector.extract_strided_slice %41 {offsets = [0, 6], sizes = [2, 2], strides = [1, 1]} : vector<2x8xf32> to vector<2x2xf32>
    %49 = math.tanh %48 : vector<2x2xf32>
    %50 = vector.extract_strided_slice %47 {offsets = [0, 0], sizes = [2, 2], strides = [1, 1]} : vector<2x6xf32> to vector<2x2xf32>
    %51 = vector.extract_strided_slice %47 {offsets = [0, 2], sizes = [2, 2], strides = [1, 1]} : vector<2x6xf32> to vector<2x2xf32>
    %52 = vector.extract_strided_slice %47 {offsets = [0, 4], sizes = [2, 2], strides = [1, 1]} : vector<2x6xf32> to vector<2x2xf32>
    %53 = arith.mulf %51, %15 : vector<2x2xf32>
    %54 = arith.mulf %50, %49 : vector<2x2xf32>
    %55 = arith.addf %53, %54 : vector<2x2xf32>
    %56 = math.tanh %55 : vector<2x2xf32>
    %57 = arith.mulf %52, %56 : vector<2x2xf32>
    %58 = tpu.concatenate %57, %37 in 1 : vector<2x2xf32>, vector<2x2xf32> -> vector<2x4xf32>
    %cst_19 = arith.constant dense<0.000000e+00> : vector<2x8xf32>
    %59 = tpu.matmul %58, %2, %cst_19 {dimension_numbers = #tpu.dot_dimension_numbers<[1], [0], [0], [1], [0, 0, 1, 1], [], []>} : vector<2x4xf32>, vector<4x8xf32>, vector<2x8xf32> -> vector<2x8xf32>
    %60 = vector.broadcast %3 : vector<1x8xf32> to vector<2x8xf32>
    %61 = arith.addf %59, %60 : vector<2x8xf32>
    %62 = vector.extract_strided_slice %61 {offsets = [0, 0], sizes = [2, 6], strides = [1, 1]} : vector<2x8xf32> to vector<2x6xf32>
    %63 = arith.negf %62 : vector<2x6xf32>
    %64 = math.exp %63 : vector<2x6xf32>
    %cst_20 = arith.constant 1.000000e+00 : f32
    %65 = vector.broadcast %cst_20 : f32 to vector<2x6xf32>
    %66 = arith.addf %65, %64 : vector<2x6xf32>
    %67 = arith.divf %65, %66 : vector<2x6xf32>
    %68 = vector.extract_strided_slice %61 {offsets = [0, 6], sizes = [2, 2], strides = [1, 1]} : vector<2x8xf32> to vector<2x2xf32>
    %69 = math.tanh %68 : vector<2x2xf32>
    %70 = vector.extract_strided_slice %67 {offsets = [0, 0], sizes = [2, 2], strides = [1, 1]} : vector<2x6xf32> to vector<2x2xf32>
    %71 = vector.extract_strided_slice %67 {offsets = [0, 2], sizes = [2, 2], strides = [1, 1]} : vector<2x6xf32> to vector<2x2xf32>
    %72 = vector.extract_strided_slice %67 {offsets = [0, 4], sizes = [2, 2], strides = [1, 1]} : vector<2x6xf32> to vector<2x2xf32>
    %73 = arith.mulf %71, %35 : vector<2x2xf32>
    %74 = arith.mulf %70, %69 : vector<2x2xf32>
    %75 = arith.addf %73, %74 : vector<2x2xf32>
    %76 = math.tanh %75 : vector<2x2xf32>
    %77 = arith.mulf %72, %76 : vector<2x2xf32>
    %78 = tpu.concatenate %77, %57 in 1 : vector<2x2xf32>, vector<2x2xf32> -> vector<2x4xf32>
    %cst_21 = arith.constant dense<0.000000e+00> : vector<2x8xf32>
    %79 = tpu.matmul %78, %6, %cst_21 {dimension_numbers = #tpu.dot_dimension_numbers<[1], [0], [0], [1], [0, 0, 1, 1], [], []>} : vector<2x4xf32>, vector<4x8xf32>, vector<2x8xf32> -> vector<2x8xf32>
    %80 = vector.broadcast %7 : vector<1x8xf32> to vector<2x8xf32>
    %81 = arith.addf %79, %80 : vector<2x8xf32>
    %82 = vector.extract_strided_slice %81 {offsets = [0, 0], sizes = [2, 6], strides = [1, 1]} : vector<2x8xf32> to vector<2x6xf32>
    %83 = arith.negf %82 : vector<2x6xf32>
    %84 = math.exp %83 : vector<2x6xf32>
    %cst_22 = arith.constant 1.000000e+00 : f32
    %85 = vector.broadcast %cst_22 : f32 to vector<2x6xf32>
    %86 = arith.addf %85, %84 : vector<2x6xf32>
    %87 = arith.divf %85, %86 : vector<2x6xf32>
    %88 = vector.extract_strided_slice %81 {offsets = [0, 6], sizes = [2, 2], strides = [1, 1]} : vector<2x8xf32> to vector<2x2xf32>
    %89 = math.tanh %88 : vector<2x2xf32>
    %90 = vector.extract_strided_slice %87 {offsets = [0, 0], sizes = [2, 2], strides = [1, 1]} : vector<2x6xf32> to vector<2x2xf32>
    %91 = vector.extract_strided_slice %87 {offsets = [0, 2], sizes = [2, 2], strides = [1, 1]} : vector<2x6xf32> to vector<2x2xf32>
    %92 = vector.extract_strided_slice %87 {offsets = [0, 4], sizes = [2, 2], strides = [1, 1]} : vector<2x6xf32> to vector<2x2xf32>
    %93 = arith.mulf %91, %55 : vector<2x2xf32>
    %94 = arith.mulf %90, %89 : vector<2x2xf32>
    %95 = arith.addf %93, %94 : vector<2x2xf32>
    %96 = math.tanh %95 : vector<2x2xf32>
    %97 = arith.mulf %92, %96 : vector<2x2xf32>
    %98 = tpu.concatenate %97, %77 in 1 : vector<2x2xf32>, vector<2x2xf32> -> vector<2x4xf32>
    %cst_23 = arith.constant dense<0.000000e+00> : vector<2x8xf32>
    %99 = tpu.matmul %98, %2, %cst_23 {dimension_numbers = #tpu.dot_dimension_numbers<[1], [0], [0], [1], [0, 0, 1, 1], [], []>} : vector<2x4xf32>, vector<4x8xf32>, vector<2x8xf32> -> vector<2x8xf32>
    %100 = vector.broadcast %3 : vector<1x8xf32> to vector<2x8xf32>
    %101 = arith.addf %99, %100 : vector<2x8xf32>
    %102 = vector.extract_strided_slice %101 {offsets = [0, 0], sizes = [2, 6], strides = [1, 1]} : vector<2x8xf32> to vector<2x6xf32>
    %103 = arith.negf %102 : vector<2x6xf32>
    %104 = math.exp %103 : vector<2x6xf32>
    %cst_24 = arith.constant 1.000000e+00 : f32
    %105 = vector.broadcast %cst_24 : f32 to vector<2x6xf32>
    %106 = arith.addf %105, %104 : vector<2x6xf32>
    %107 = arith.divf %105, %106 : vector<2x6xf32>
    %108 = vector.extract_strided_slice %101 {offsets = [0, 6], sizes = [2, 2], strides = [1, 1]} : vector<2x8xf32> to vector<2x2xf32>
    %109 = math.tanh %108 : vector<2x2xf32>
    %110 = vector.extract_strided_slice %107 {offsets = [0, 0], sizes = [2, 2], strides = [1, 1]} : vector<2x6xf32> to vector<2x2xf32>
    %111 = vector.extract_strided_slice %107 {offsets = [0, 2], sizes = [2, 2], strides = [1, 1]} : vector<2x6xf32> to vector<2x2xf32>
    %112 = vector.extract_strided_slice %107 {offsets = [0, 4], sizes = [2, 2], strides = [1, 1]} : vector<2x6xf32> to vector<2x2xf32>
    %113 = arith.mulf %111, %75 : vector<2x2xf32>
    %114 = arith.mulf %110, %109 : vector<2x2xf32>
    %115 = arith.addf %113, %114 : vector<2x2xf32>
    %116 = math.tanh %115 : vector<2x2xf32>
    %117 = arith.mulf %112, %116 : vector<2x2xf32>
    %118 = tpu.concatenate %117, %97 in 1 : vector<2x2xf32>, vector<2x2xf32> -> vector<2x4xf32>
    %cst_25 = arith.constant dense<0.000000e+00> : vector<2x8xf32>
    %119 = tpu.matmul %118, %6, %cst_25 {dimension_numbers = #tpu.dot_dimension_numbers<[1], [0], [0], [1], [0, 0, 1, 1], [], []>} : vector<2x4xf32>, vector<4x8xf32>, vector<2x8xf32> -> vector<2x8xf32>
    %120 = vector.broadcast %7 : vector<1x8xf32> to vector<2x8xf32>
    %121 = arith.addf %119, %120 : vector<2x8xf32>
    %122 = vector.extract_strided_slice %121 {offsets = [0, 0], sizes = [2, 6], strides = [1, 1]} : vector<2x8xf32> to vector<2x6xf32>
    %123 = arith.negf %122 : vector<2x6xf32>
    %124 = math.exp %123 : vector<2x6xf32>
    %cst_26 = arith.constant 1.000000e+00 : f32
    %125 = vector.broadcast %cst_26 : f32 to vector<2x6xf32>
    %126 = arith.addf %125, %124 : vector<2x6xf32>
    %127 = arith.divf %125, %126 : vector<2x6xf32>
    %128 = vector.extract_strided_slice %121 {offsets = [0, 6], sizes = [2, 2], strides = [1, 1]} : vector<2x8xf32> to vector<2x2xf32>
    %129 = math.tanh %128 : vector<2x2xf32>
    %130 = vector.extract_strided_slice %127 {offsets = [0, 0], sizes = [2, 2], strides = [1, 1]} : vector<2x6xf32> to vector<2x2xf32>
    %131 = vector.extract_strided_slice %127 {offsets = [0, 2], sizes = [2, 2], strides = [1, 1]} : vector<2x6xf32> to vector<2x2xf32>
    %132 = vector.extract_strided_slice %127 {offsets = [0, 4], sizes = [2, 2], strides = [1, 1]} : vector<2x6xf32> to vector<2x2xf32>
    %133 = arith.mulf %131, %95 : vector<2x2xf32>
    %134 = arith.mulf %130, %129 : vector<2x2xf32>
    %135 = arith.addf %133, %134 : vector<2x2xf32>
    %136 = math.tanh %135 : vector<2x2xf32>
    %137 = arith.mulf %132, %136 : vector<2x2xf32>
    %138 = tpu.concatenate %137, %117 in 1 : vector<2x2xf32>, vector<2x2xf32> -> vector<2x4xf32>
    %cst_27 = arith.constant dense<0.000000e+00> : vector<2x8xf32>
    %139 = tpu.matmul %138, %2, %cst_27 {dimension_numbers = #tpu.dot_dimension_numbers<[1], [0], [0], [1], [0, 0, 1, 1], [], []>} : vector<2x4xf32>, vector<4x8xf32>, vector<2x8xf32> -> vector<2x8xf32>
    %140 = vector.broadcast %3 : vector<1x8xf32> to vector<2x8xf32>
    %141 = arith.addf %139, %140 : vector<2x8xf32>
    %142 = vector.extract_strided_slice %141 {offsets = [0, 0], sizes = [2, 6], strides = [1, 1]} : vector<2x8xf32> to vector<2x6xf32>
    %143 = arith.negf %142 : vector<2x6xf32>
    %144 = math.exp %143 : vector<2x6xf32>
    %cst_28 = arith.constant 1.000000e+00 : f32
    %145 = vector.broadcast %cst_28 : f32 to vector<2x6xf32>
    %146 = arith.addf %145, %144 : vector<2x6xf32>
    %147 = arith.divf %145, %146 : vector<2x6xf32>
    %148 = vector.extract_strided_slice %141 {offsets = [0, 6], sizes = [2, 2], strides = [1, 1]} : vector<2x8xf32> to vector<2x2xf32>
    %149 = math.tanh %148 : vector<2x2xf32>
    %150 = vector.extract_strided_slice %147 {offsets = [0, 0], sizes = [2, 2], strides = [1, 1]} : vector<2x6xf32> to vector<2x2xf32>
    %151 = vector.extract_strided_slice %147 {offsets = [0, 2], sizes = [2, 2], strides = [1, 1]} : vector<2x6xf32> to vector<2x2xf32>
    %152 = vector.extract_strided_slice %147 {offsets = [0, 4], sizes = [2, 2], strides = [1, 1]} : vector<2x6xf32> to vector<2x2xf32>
    %153 = arith.mulf %151, %115 : vector<2x2xf32>
    %154 = arith.mulf %150, %149 : vector<2x2xf32>
    %155 = arith.addf %153, %154 : vector<2x2xf32>
    %156 = math.tanh %155 : vector<2x2xf32>
    %157 = arith.mulf %152, %156 : vector<2x2xf32>
    %158 = tpu.concatenate %157, %137 in 1 : vector<2x2xf32>, vector<2x2xf32> -> vector<2x4xf32>
    %cst_29 = arith.constant dense<0.000000e+00> : vector<2x8xf32>
    %159 = tpu.matmul %158, %6, %cst_29 {dimension_numbers = #tpu.dot_dimension_numbers<[1], [0], [0], [1], [0, 0, 1, 1], [], []>} : vector<2x4xf32>, vector<4x8xf32>, vector<2x8xf32> -> vector<2x8xf32>
    %160 = vector.broadcast %7 : vector<1x8xf32> to vector<2x8xf32>
    %161 = arith.addf %159, %160 : vector<2x8xf32>
    %162 = vector.extract_strided_slice %161 {offsets = [0, 0], sizes = [2, 6], strides = [1, 1]} : vector<2x8xf32> to vector<2x6xf32>
    %163 = arith.negf %162 : vector<2x6xf32>
    %164 = math.exp %163 : vector<2x6xf32>
    %cst_30 = arith.constant 1.000000e+00 : f32
    %165 = vector.broadcast %cst_30 : f32 to vector<2x6xf32>
    %166 = arith.addf %165, %164 : vector<2x6xf32>
    %167 = arith.divf %165, %166 : vector<2x6xf32>
    %168 = vector.extract_strided_slice %161 {offsets = [0, 6], sizes = [2, 2], strides = [1, 1]} : vector<2x8xf32> to vector<2x2xf32>
    %169 = math.tanh %168 : vector<2x2xf32>
    %170 = vector.extract_strided_slice %167 {offsets = [0, 0], sizes = [2, 2], strides = [1, 1]} : vector<2x6xf32> to vector<2x2xf32>
    %171 = vector.extract_strided_slice %167 {offsets = [0, 2], sizes = [2, 2], strides = [1, 1]} : vector<2x6xf32> to vector<2x2xf32>
    %172 = vector.extract_strided_slice %167 {offsets = [0, 4], sizes = [2, 2], strides = [1, 1]} : vector<2x6xf32> to vector<2x2xf32>
    %173 = arith.mulf %171, %135 : vector<2x2xf32>
    %174 = arith.mulf %170, %169 : vector<2x2xf32>
    %175 = arith.addf %173, %174 : vector<2x2xf32>
    %176 = math.tanh %175 : vector<2x2xf32>
    %177 = arith.mulf %172, %176 : vector<2x2xf32>
    %178 = tpu.concatenate %57, %97, %137, %177 in 1 : vector<2x2xf32>, vector<2x2xf32>, vector<2x2xf32>, vector<2x2xf32> -> vector<2x8xf32>
    %c0_31 = arith.constant 0 : index
    %c0_32 = arith.constant 0 : index
    %179 = vector.load %arg2[%c0_31, %c0_32] : memref<2x8xf32, #tpu.memory_space<vmem>>, vector<2x8xf32>
    tpu.vector_store %arg2[%c0_31, %c0_32], %178 {strides = array<i32>} : memref<2x8xf32, #tpu.memory_space<vmem>>, vector<2x8xf32>,
    return
  }
}

</mosaic_0001>

<bundles_post_ra>
// kernel: lstm_cell_stacked.1
= control target key start
LH: loop header
LB: loop body
LE: loop exit
PB: predicated region body
PF: predicated region fallthrough
CT: control target
= control target key end

     0   :  { %vm37_vm0 = vcmask 1043456   ;;  %v1055_v1 = vmov 0.0   ;;  %vm1056_vm1 = vmmov 0   ;;  %s1057_s13 = smov 2   ;;  %vm27_vm2 = vcmask 15360   ;;  %s1058_s18 = smov 122   ;;  %s1239_s0 = inlined_call_operand.vmem [shape: f32[5,2,2], index: 0, kind: input, shape index: {}]   ;;  %s1240_s1 = inlined_call_operand.vmem [shape: f32[2,5,8], index: 1, kind: input, shape index: {}]   ;;  %s1241_s2 = inlined_call_operand.vmem [shape: f32[2,8], index: 2, kind: output, shape index: {}]  }
   0x1   :  { %v901_v0 = vld [vmem:[%s1239_s0 + $0x2] sm:$0x3]  ;;  %945 = vmatprep.subr.mxu0 %v1055_v1  ;;  %947 = vmatprep.mubr.msk.f32.mxu0 %vm1056_vm1, %v1055_v1  ;;  %v903_v3 = vld [vmem:[%s1239_s0 + $0x6] sm:$0x3]  ;;  %v22_v4 = vld [vmem:[%s1239_s0] sm:$0x3]  ;;  %v29_v7 = vlaneseq }
   0x2   :  { %v1083_v2 = vld [vmem:[%s1240_s1] sm:$0x1f]  ;;  %24 = vrot.lane.b32.xlu0 %v901_v0, %s1057_s13  ;;  %119 = vrot.lane.b32.xlu1 %v903_v3, %s1057_s13  ;;  %vm33_vm3 = vcmask 31744   ;;  %v1125_v27 = vld [vmem:[%s1240_s1 + $0x8] sm:$0x1f]  ;;  %s1059_s25 = smov 124  }
   0x3   :  { %946 = vmatpush3.msk.msra.mxu0 %vm37_vm0, %v1083_v2  ;;  %950 = vmatprep.subr.mxu1 %v1055_v1  ;;  %v30_v8 = vshrl.u32 %v29_v7, 7  ;;  %v902_v26 = vld [vmem:[%s1239_s0 + $0x4] sm:$0x3]  ;;  %v904_v28 = vld [vmem:[%s1239_s0 + $0x8] sm:$0x3]  ;;  %s1060_s0 = smov 126  }
   0x4   :  { %952 = vmatprep.mubr.msk.f32.mxu1 %vm1056_vm1, %v1055_v1  ;;  %955 = vmatprep.subr.mxu0 %v1055_v1  ;;  %vm892_vm4 = vcmask 48128   ;;  %vm894_vm5 = vcmask 58368  }
   0x5   :  { %v31_v9 = vsub.s32 4, %v30_v8  ;;  %951 = vmatpush3.msk.msra.mxu1 %vm37_vm0, %v1125_v27 }
   0x6   :  { %960 = vmatprep.subr.mxu1 %v1055_v1 }
   0x7   :  { %v1109_v10 = vrot.slane %v1083_v2, %v31_v9  ;;  %v1143_v34 = vrot.slane %v1125_v27, %v31_v9 }
  0x74   :  { %v25_v5 = vpop.permute.xlu0 %24  ;;  %v120_v21 = vpop.permute.xlu1 %119 }
  0x75   :  { %v28_v6 = vsel %vm27_vm2, %v22_v4, %v25_v5 }
  0x76   :  { %948 = vmatmul.mubr.msk.f32.vlgmr.msra.gmra.mrb[0].mxu0 %vm33_vm3, %v28_v6 }
  0x77   :  { %956 = vmatpush3.msk.msra.mxu0 %vm37_vm0, %v1083_v2  ;;  %957 = vmatprep.mubr.msk.f32.mxu0 %vm1056_vm1, %v1055_v1 }
  0x78   :  { %965 = vmatprep.subr.mxu0 %v1055_v1 }
 0x149   :  { %v107_v11 = vpop.f32.mrb[0].mxu0 }
 0x14a   :  { %v108_v12 = vadd.f32 %v107_v11, %v1109_v10  ;;  %v949_v13 = vpop.f32.mrb[1].mxu0 }
 0x14c   :  { %991 = vtanh.f32 %v108_v12  ;;  %v907_v15 = vmul.f32 -1.442695, %v108_v12 }
 0x14e   :  { %993 = vpow2.f32 %v907_v15 }
 0x156   :  { %v992_v14 = vpop.eup %991 }
 0x157   :  { %124 = vrot.lane.b32.xlu0 %v992_v14, %s1058_s18 }
 0x158   :  { %v994_v16 = vpop.eup %993 }
 0x159   :  { %v114_v17 = vadd.f32 1.0, %v994_v16 }
 0x15b   :  { %995 = vrcp.f32 %v114_v17 }
 0x165   :  { %v996_v18 = vpop.eup %995 }
 0x166   :  { %v122_v22 = vmul.f32 %v996_v18, %v120_v21 }
 0x1c9   :  { %v125_v19 = vpop.permute.xlu0 %124 }
 0x1ca   :  { %v127_v20 = vmul.f32 %v996_v18, %v125_v19 }
 0x1cc   :  { %129 = vrot.lane.b32.xlu1 %v127_v20, %s1057_s13 }
 0x23e   :  { %v130_v23 = vpop.permute.xlu1 %129 }
 0x23f   :  { %v1114_v24 = vadd.f32 %v130_v23, %v122_v22 }
 0x241   :  { %997 = vtanh.f32 %v1114_v24 }
 0x24b   :  { %v998_v25 = vpop.eup %997 }
 0x24c   :  { %135 = vrot.lane.b32.xlu0 %v998_v25, %s1057_s13 }
 0x250   :  { %144 = vrot.lane.b32.xlu0 %v902_v26, %s1057_s13 }
 0x254   :  { %236 = vrot.lane.b32.xlu0 %v904_v28, %s1057_s13 }
 0x2be   :  { %v136_v29 = vpop.permute.xlu0 %135 }
 0x2bf   :  { %v138_v30 = vmul.f32 %v996_v18, %v136_v29 }
 0x2c1   :  { %140 = vrot.lane.b32.xlu1 %v138_v30, %s1059_s25 }
 0x2c2   :  { %v145_v31 = vpop.permute.xlu0 %144 }
 0x2c6   :  { %v237_v45 = vpop.permute.xlu0 %236 }
 0x333   :  { %v141_v32 = vpop.permute.xlu1 %140 }
 0x334   :  { %v147_v33 = vsel %vm27_vm2, %v141_v32, %v145_v31 }
 0x335   :  { %953 = vmatmul.mubr.msk.f32.vlgmr.msra.gmra.mrb[0].mxu1 %vm33_vm3, %v147_v33 }
 0x336   :  { %961 = vmatpush3.msk.msra.mxu1 %vm37_vm0, %v1125_v27  ;;  %962 = vmatprep.mubr.msk.f32.mxu1 %vm1056_vm1, %v1055_v1 }
 0x337   :  { %970 = vmatprep.subr.mxu1 %v1055_v1 }
 0x408   :  { %v224_v35 = vpop.f32.mrb[0].mxu1 }
 0x409   :  { %v225_v36 = vadd.f32 %v224_v35, %v1143_v34  ;;  %v954_v37 = vpop.f32.mrb[1].mxu1 }
 0x40b   :  { %999 = vtanh.f32 %v225_v36  ;;  %v910_v39 = vmul.f32 -1.442695, %v225_v36 }
 0x40d   :  { %1001 = vpow2.f32 %v910_v39 }
 0x415   :  { %v1000_v38 = vpop.eup %999 }
 0x416   :  { %241 = vrot.lane.b32.xlu1 %v1000_v38, %s1058_s18 }
 0x417   :  { %v1002_v40 = vpop.eup %1001 }
 0x418   :  { %v231_v41 = vadd.f32 1.0, %v1002_v40 }
 0x41a   :  { %1003 = vrcp.f32 %v231_v41 }
 0x424   :  { %v1004_v42 = vpop.eup %1003 }
 0x425   :  { %v239_v46 = vmul.f32 %v1004_v42, %v237_v45 }
 0x488   :  { %v242_v43 = vpop.permute.xlu1 %241 }
 0x489   :  { %v244_v44 = vmul.f32 %v1004_v42, %v242_v43 }
 0x48b   :  { %246 = vrot.lane.b32.xlu1 %v244_v44, %s1057_s13 }
 0x4fd   :  { %v247_v47 = vpop.permute.xlu1 %246 }
 0x4fe   :  { %v1148_v48 = vadd.f32 %v247_v47, %v239_v46 }
 0x500   :  { %1005 = vtanh.f32 %v1148_v48 }
 0x50a   :  { %v1006_v49 = vpop.eup %1005 }
 0x50b   :  { %252 = vrot.lane.b32.xlu0 %v1006_v49, %s1057_s13 }
 0x50f   :  { %260 = vrot.lane.b32.xlu0 %v138_v30, %s1060_s0 }
 0x57d   :  { %v253_v50 = vpop.permute.xlu0 %252 }
 0x57e   :  { %v255_v51 = vmul.f32 %v1004_v42, %v253_v50 }
 0x580   :  { %257 = vrot.lane.b32.xlu1 %v255_v51, %s1059_s25 }
 0x581   :  { %v261_v52 = vpop.permute.xlu0 %260 }
 0x5f2   :  { %v1154_v53 = vpop.permute.xlu1 %257 }
 0x5f3   :  { %v263_v54 = vsel %vm27_vm2, %v1154_v53, %v261_v52 }
 0x5f4   :  { %958 = vmatmul.mubr.msk.f32.vlgmr.msra.gmra.mrb[2].mxu0 %vm33_vm3, %v263_v54 }
 0x5f5   :  { %966 = vmatpush3.msk.msra.mxu0 %vm37_vm0, %v1083_v2  ;;  %967 = vmatprep.mubr.msk.f32.mxu0 %vm1056_vm1, %v1055_v1 }
 0x5f6   :  { %975 = vmatprep.subr.mxu0 %v1055_v1 }
 0x6c7   :  { %v333_v55 = vpop.f32.mrb[2].mxu0 }
 0x6c8   :  { %v334_v56 = vadd.f32 %v333_v55, %v1109_v10  ;;  %v959_v57 = vpop.f32.mrb[3].mxu0 }
 0x6ca   :  { %1007 = vtanh.f32 %v334_v56  ;;  %v913_v59 = vmul.f32 -1.442695, %v334_v56 }
 0x6cc   :  { %1009 = vpow2.f32 %v913_v59 }
 0x6d4   :  { %v1008_v58 = vpop.eup %1007 }
 0x6d5   :  { %346 = vrot.lane.b32.xlu1 %v1008_v58, %s1058_s18 }
 0x6d6   :  { %v1010_v60 = vpop.eup %1009 }
 0x6d7   :  { %v340_v61 = vadd.f32 1.0, %v1010_v60 }
 0x6d9   :  { %1011 = vrcp.f32 %v340_v61 }
 0x6e3   :  { %v1012_v62 = vpop.eup %1011 }
 0x6e4   :  { %v344_v3 = vmul.f32 %v1012_v62, %v1114_v24 }
 0x747   :  { %v347_v63 = vpop.permute.xlu1 %346 }
 0x748   :  { %v349_v0 = vmul.f32 %v1012_v62, %v347_v63 }
 0x74a   :  { %351 = vrot.lane.b32.xlu0 %v349_v0, %s1057_s13 }
 0x7bc   :  { %v352_v4 = vpop.permute.xlu0 %351 }
 0x7bd   :  { %v354_v5 = vadd.f32 %v352_v4, %v344_v3 }
 0x7bf   :  { %1013 = vtanh.f32 %v354_v5 }
 0x7c9   :  { %v1014_v6 = vpop.eup %1013 }
 0x7ca   :  { %357 = vrot.lane.b32.xlu1 %v1014_v6, %s1057_s13 }
 0x7ce   :  { %365 = vrot.lane.b32.xlu1 %v255_v51, %s1060_s0 }
 0x83c   :  { %v358_v7 = vpop.permute.xlu1 %357 }
 0x83d   :  { %v360_v8 = vmul.f32 %v1012_v62, %v358_v7 }
 0x83f   :  { %362 = vrot.lane.b32.xlu0 %v360_v8, %s1059_s25 }
 0x840   :  { %v366_v9 = vpop.permute.xlu1 %365 }
 0x8b1   :  { %v363_v11 = vpop.permute.xlu0 %362 }
 0x8b2   :  { %v368_v12 = vsel %vm27_vm2, %v363_v11, %v366_v9 }
 0x8b3   :  { %963 = vmatmul.mubr.msk.f32.vlgmr.msra.gmra.mrb[2].mxu1 %vm33_vm3, %v368_v12 }
 0x8b4   :  { %971 = vmatpush3.msk.msra.mxu1 %vm37_vm0, %v1125_v27  ;;  %972 = vmatprep.mubr.msk.f32.mxu1 %vm1056_vm1, %v1055_v1 }
 0x8b5   :  { %980 = vmatprep.subr.mxu1 %v1055_v1 }
 0x986   :  { %v438_v13 = vpop.f32.mrb[2].mxu1 }
 0x987   :  { %v439_v14 = vadd.f32 %v438_v13, %v1143_v34  ;;  %v964_v15 = vpop.f32.mrb[3].mxu1 }
 0x989   :  { %1015 = vtanh.f32 %v439_v14  ;;  %v916_v17 = vmul.f32 -1.442695, %v439_v14 }
 0x98b   :  { %1017 = vpow2.f32 %v916_v17 }
 0x993   :  { %v1016_v16 = vpop.eup %1015 }
 0x994   :  { %451 = vrot.lane.b32.xlu0 %v1016_v16, %s1058_s18 }
 0x995   :  { %v1018_v18 = vpop.eup %1017 }
 0x996   :  { %v445_v19 = vadd.f32 1.0, %v1018_v18 }
 0x998   :  { %1019 = vrcp.f32 %v445_v19 }
 0x9a2   :  { %v1020_v20 = vpop.eup %1019 }
 0x9a3   :  { %v449_v23 = vmul.f32 %v1020_v20, %v1148_v48 }
 0xa06   :  { %v452_v21 = vpop.permute.xlu0 %451 }
 0xa07   :  { %v454_v22 = vmul.f32 %v1020_v20, %v452_v21 }
 0xa09   :  { %456 = vrot.lane.b32.xlu1 %v454_v22, %s1057_s13 }
 0xa7b   :  { %v457_v24 = vpop.permute.xlu1 %456 }
 0xa7c   :  { %v459_v25 = vadd.f32 %v457_v24, %v449_v23 }
 0xa7e   :  { %1021 = vtanh.f32 %v459_v25 }
 0xa88   :  { %v1022_v26 = vpop.eup %1021 }
 0xa89   :  { %462 = vrot.lane.b32.xlu0 %v1022_v26, %s1057_s13 }
 0xa8d   :  { %470 = vrot.lane.b32.xlu0 %v360_v8, %s1060_s0 }
 0xafb   :  { %v463_v28 = vpop.permute.xlu0 %462 }
 0xafc   :  { %v465_v29 = vmul.f32 %v1020_v20, %v463_v28 }
 0xafe   :  { %467 = vrot.lane.b32.xlu1 %v465_v29, %s1059_s25 }
 0xaff   :  { %v471_v30 = vpop.permute.xlu0 %470 }
 0xb70   :  { %v468_v31 = vpop.permute.xlu1 %467 }
 0xb71   :  { %v473_v32 = vsel %vm27_vm2, %v468_v31, %v471_v30 }
 0xb72   :  { %968 = vmatmul.mubr.msk.f32.vlgmr.msra.gmra.mrb[4].mxu0 %vm33_vm3, %v473_v32 }
 0xb73   :  { %976 = vmatpush3.msk.msra.mxu0 %vm37_vm0, %v1083_v2  ;;  %977 = vmatprep.mubr.msk.f32.mxu0 %vm1056_vm1, %v1055_v1 }
 0xc45   :  { %v543_v33 = vpop.f32.mrb[4].mxu0 }
 0xc46   :  { %v544_v35 = vadd.f32 %v543_v33, %v1109_v10  ;;  %v969_v36 = vpop.f32.mrb[5].mxu0 }
 0xc48   :  { %1023 = vtanh.f32 %v544_v35  ;;  %v919_v38 = vmul.f32 -1.442695, %v544_v35 }
 0xc4a   :  { %1025 = vpow2.f32 %v919_v38 }
 0xc52   :  { %v1024_v37 = vpop.eup %1023 }
 0xc53   :  { %556 = vrot.lane.b32.xlu1 %v1024_v37, %s1058_s18 }
 0xc54   :  { %v1026_v39 = vpop.eup %1025 }
 0xc55   :  { %v550_v40 = vadd.f32 1.0, %v1026_v39 }
 0xc57   :  { %1027 = vrcp.f32 %v550_v40 }
 0xc61   :  { %v1028_v41 = vpop.eup %1027 }
 0xc62   :  { %v554_v2 = vmul.f32 %v1028_v41, %v354_v5 }
 0xcc5   :  { %v557_v42 = vpop.permute.xlu1 %556 }
 0xcc6   :  { %v559_v43 = vmul.f32 %v1028_v41, %v557_v42 }
 0xcc8   :  { %561 = vrot.lane.b32.xlu0 %v559_v43, %s1057_s13 }
 0xd3a   :  { %v562_v44 = vpop.permute.xlu0 %561 }
 0xd3b   :  { %v564_v45 = vadd.f32 %v562_v44, %v554_v2 }
 0xd3d   :  { %1029 = vtanh.f32 %v564_v45 }
 0xd47   :  { %v1030_v46 = vpop.eup %1029 }
 0xd48   :  { %567 = vrot.lane.b32.xlu1 %v1030_v46, %s1057_s13 }
 0xd4c   :  { %575 = vrot.lane.b32.xlu1 %v465_v29, %s1060_s0 }
 0xdba   :  { %v568_v47 = vpop.permute.xlu1 %567 }
 0xdbb   :  { %v570_v48 = vmul.f32 %v1028_v41, %v568_v47 }
 0xdbd   :  { %572 = vrot.lane.b32.xlu0 %v570_v48, %s1059_s25 }
 0xdbe   :  { %v1197_v49 = vpop.permute.xlu1 %575 }
 0xdbf   :  { %v890_v2 = vsel %vm27_vm2, %v1154_v53, %v1197_v49 }
 0xe2f   :  { %v573_v50 = vpop.permute.xlu0 %572 }
 0xe30   :  { %v578_v51 = vsel %vm27_vm2, %v573_v50, %v1197_v49 }
 0xe31   :  { %973 = vmatmul.mubr.msk.f32.vlgmr.msra.gmra.mrb[4].mxu1 %vm33_vm3, %v578_v51 }
 0xe32   :  { %981 = vmatpush3.msk.msra.mxu1 %vm37_vm0, %v1125_v27  ;;  %982 = vmatprep.mubr.msk.f32.mxu1 %vm1056_vm1, %v1055_v1 }
 0xf04   :  { %v648_v52 = vpop.f32.mrb[4].mxu1 }
 0xf05   :  { %v649_v54 = vadd.f32 %v648_v52, %v1143_v34  ;;  %v974_v55 = vpop.f32.mrb[5].mxu1 }
 0xf07   :  { %1031 = vtanh.f32 %v649_v54  ;;  %v922_v57 = vmul.f32 -1.442695, %v649_v54 }
 0xf09   :  { %1033 = vpow2.f32 %v922_v57 }
 0xf11   :  { %v1032_v56 = vpop.eup %1031 }
 0xf12   :  { %661 = vrot.lane.b32.xlu0 %v1032_v56, %s1058_s18 }
 0xf13   :  { %v1034_v58 = vpop.eup %1033 }
 0xf14   :  { %v655_v59 = vadd.f32 1.0, %v1034_v58 }
 0xf16   :  { %1035 = vrcp.f32 %v655_v59 }
 0xf20   :  { %v1036_v60 = vpop.eup %1035 }
 0xf21   :  { %v659_v27 = vmul.f32 %v1036_v60, %v459_v25 }
 0xf84   :  { %v662_v61 = vpop.permute.xlu0 %661 }
 0xf85   :  { %v664_v62 = vmul.f32 %v1036_v60, %v662_v61 }
 0xf87   :  { %666 = vrot.lane.b32.xlu1 %v664_v62, %s1057_s13 }
 0xff9   :  { %v667_v1 = vpop.permute.xlu1 %666 }
 0xffa   :  { %v669_v63 = vadd.f32 %v667_v1, %v659_v27 }
 0xffc   :  { %1037 = vtanh.f32 %v669_v63 }
0x1006   :  { %v1038_v0 = vpop.eup %1037 }
0x1007   :  { %672 = vrot.lane.b32.xlu0 %v1038_v0, %s1057_s13 }
0x100b   :  { %680 = vrot.lane.b32.xlu0 %v570_v48, %s1060_s0 }
0x1079   :  { %v673_v3 = vpop.permute.xlu0 %672 }
0x107a   :  { %v1211_v4 = vmul.f32 %v1036_v60, %v673_v3 }
0x107c   :  { %677 = vrot.lane.b32.xlu1 %v1211_v4, %s1059_s25  ;;  %v891_v44 = vsel %vm33_vm3, %v890_v2, %v1211_v4 }
0x107d   :  { %v681_v5 = vpop.permute.xlu0 %680 }
0x10ee   :  { %v678_v6 = vpop.permute.xlu1 %677 }
0x10ef   :  { %v683_v7 = vsel %vm27_vm2, %v678_v6, %v681_v5 }
0x10f0   :  { %978 = vmatmul.mubr.msk.f32.vlgmr.msra.gmra.mrb[6].mxu0 %vm33_vm3, %v683_v7 }
0x11c3   :  { %v753_v8 = vpop.f32.mrb[6].mxu0 }
0x11c4   :  { %v754_v9 = vadd.f32 %v753_v8, %v1109_v10  ;;  %v979_v11 = vpop.f32.mrb[7].mxu0 }
0x11c6   :  { %1039 = vtanh.f32 %v754_v9  ;;  %v925_v13 = vmul.f32 -1.442695, %v754_v9 }
0x11c8   :  { %1041 = vpow2.f32 %v925_v13 }
0x11d0   :  { %v1040_v12 = vpop.eup %1039 }
0x11d1   :  { %766 = vrot.lane.b32.xlu1 %v1040_v12, %s1058_s18 }
0x11d2   :  { %v1042_v14 = vpop.eup %1041 }
0x11d3   :  { %v760_v15 = vadd.f32 1.0, %v1042_v14 }
0x11d5   :  { %1043 = vrcp.f32 %v760_v15 }
0x11df   :  { %v1044_v16 = vpop.eup %1043 }
0x11e0   :  { %v764_v19 = vmul.f32 %v1044_v16, %v564_v45 }
0x1243   :  { %v767_v17 = vpop.permute.xlu1 %766 }
0x1244   :  { %v769_v18 = vmul.f32 %v1044_v16, %v767_v17 }
0x1246   :  { %771 = vrot.lane.b32.xlu0 %v769_v18, %s1057_s13 }
0x12b8   :  { %v772_v20 = vpop.permute.xlu0 %771 }
0x12b9   :  { %v774_v21 = vadd.f32 %v772_v20, %v764_v19 }
0x12bb   :  { %1045 = vtanh.f32 %v774_v21 }
0x12c5   :  { %v1046_v10 = vpop.eup %1045 }
0x12c6   :  { %777 = vrot.lane.b32.xlu1 %v1046_v10, %s1057_s13 }
0x12ca   :  { %785 = vrot.lane.b32.xlu1 %v1211_v4, %s1060_s0 }
0x1338   :  { %v778_v22 = vpop.permute.xlu1 %777 }
0x1339   :  { %v780_v23 = vmul.f32 %v1044_v16, %v778_v22 }
0x133b   :  { %782 = vrot.lane.b32.xlu0 %v780_v23, %s1059_s25 }
0x133c   :  { %v786_v24 = vpop.permute.xlu1 %785 }
0x13ad   :  { %v783_v25 = vpop.permute.xlu0 %782 }
0x13ae   :  { %v788_v26 = vsel %vm27_vm2, %v783_v25, %v786_v24 }
0x13af   :  { %983 = vmatmul.mubr.msk.f32.vlgmr.msra.gmra.mrb[6].mxu1 %vm33_vm3, %v788_v26 }
0x1482   :  { %v858_v28 = vpop.f32.mrb[6].mxu1 }
0x1483   :  { %v859_v29 = vadd.f32 %v858_v28, %v1143_v34  ;;  %v984_v30 = vpop.f32.mrb[7].mxu1 }
0x1485   :  { %1047 = vtanh.f32 %v859_v29  ;;  %v928_v32 = vmul.f32 -1.442695, %v859_v29 }
0x1487   :  { %1049 = vpow2.f32 %v928_v32 }
0x148f   :  { %v1048_v31 = vpop.eup %1047 }
0x1490   :  { %871 = vrot.lane.b32.xlu0 %v1048_v31, %s1058_s18 }
0x1491   :  { %v1050_v33 = vpop.eup %1049 }
0x1492   :  { %v865_v35 = vadd.f32 1.0, %v1050_v33 }
0x1494   :  { %1051 = vrcp.f32 %v865_v35 }
0x149e   :  { %v1052_v36 = vpop.eup %1051 }
0x149f   :  { %v869_v39 = vmul.f32 %v1052_v36, %v669_v63 }
0x1502   :  { %v872_v37 = vpop.permute.xlu0 %871 }
0x1503   :  { %v874_v38 = vmul.f32 %v1052_v36, %v872_v37 }
0x1505   :  { %876 = vrot.lane.b32.xlu1 %v874_v38, %s1057_s13 }
0x1577   :  { %v877_v40 = vpop.permute.xlu1 %876 }
0x1578   :  { %v879_v41 = vadd.f32 %v877_v40, %v869_v39 }
0x157a   :  { %1053 = vtanh.f32 %v879_v41 }
0x1584   :  { %v1054_v34 = vpop.eup %1053 }
0x1585   :  { %882 = vrot.lane.b32.xlu0 %v1054_v34, %s1057_s13 }
0x15f7   :  { %v883_v42 = vpop.permute.xlu0 %882 }
0x15f8   :  { %v885_v43 = vmul.f32 %v1052_v36, %v883_v42 }
0x15fa   :  { %887 = vrot.lane.b32.xlu1 %v885_v43, %s1057_s13 }
0x166c   :  { %v888_v45 = vpop.permute.xlu1 %887 }
0x166d   :  { %v893_v46 = vsel %vm892_vm4, %v891_v44, %v888_v45 }
0x166e   :  { %895 = vst.msk [vmem:[%s1241_s2] sm:$0x3] %vm894_vm5, %v893_v46 }

</bundles_post_ra>
